<compile_context>
chip_gen: v5e
topology: v5e:2x2
jax: 0.10.0
libtpu: 0.0.40
codegen_flags: <defaults>
</compile_context>

<pallas_src>
import math
import functools

import jax
import jax.numpy as jnp
from jax.experimental import pallas as pl
from jax.experimental.pallas import tpu as pltpu


# ----------------------------- helpers --------------------------------------


def _ln_f32(h, g, b, eps):
    # one-pass LayerNorm stats: var = E[x^2] - E[x]^2 (halves XLU reduction passes)
    mu = jnp.mean(h, axis=-1, keepdims=True)
    ms = jnp.mean(h * h, axis=-1, keepdims=True)
    var = jnp.maximum(ms - mu * mu, 0.0)
    return (h - mu) * jax.lax.rsqrt(var + eps) * g + b


def _default_vmem_limit_bytes():
    # Raise the scoped VMEM limit well above the 16/32 MiB default, leaving
    # ~20% headroom below physical capacity (128 MiB v5e/v6e, 64 MiB v7x).
    try:
        cap = pltpu.get_tpu_info().vmem_capacity_bytes
        return int(cap * 0.8)
    except Exception:
        return 64 * 1024 * 1024  # conservative fallback, safe on all chips


def _pick_batch_block(B, S):
    """Roofline-driven batch tile: rows_blk = batch_block*S should be large
    enough to stay MXU-bound vs. the streamed bf16 weights (~240 flops/byte on
    v5e, ~320 v7x, ~700 v6e) while fitting VMEM, and nb = B/batch_block >= 2 is
    preferred so the 'parallel' batch axis can shard across v7x's two cores."""
    target_rows, max_rows = 1024, 4096
    divs = [d for d in range(1, B + 1) if B % d == 0]
    # smallest divisor that still meets the rows target and leaves nb >= 2
    cands = [d for d in divs if d < B and d * S >= target_rows]
    if cands:
        return min(cands)
    # otherwise: biggest tile that still fits comfortably
    fit = [d for d in divs if d * S <= max_rows]
    return max(fit) if fit else 1


# ----------------------------- Pallas kernel -------------------------------


def _fused_encoder_kernel(
    x_ref,                                   # (rows, D) input batch tile
    wqkv_ref, bqkv_ref,                      # (D, 3D), (1, 3D)   per-layer (layer dim squeezed)
    wo_ref,                                  # (D, D)
    w1_ref, b1_ref,                          # (D, F), (1, F)
    w2_ref,                                  # (F, D)
    pvec_ref,                                # (6, D): [bo, b2, g1, be1, g2, be2]
    fnorm_ref,                               # (2, D): [final gamma, final beta]
    o_ref,                                   # (rows, D) — resident across the layer axis
    *, n_seq, seq_len, d_model, eps, mm_dtype, apply_final_norm, approx_softmax,
):
    l = pl.program_id(1)
    last = pl.num_programs(1) - 1
    rows = n_seq * seq_len

    # Layer 0 consumes the freshly DMA'd input block; later layers consume the
    # previous layer's output, resident in the VMEM output block (out index_map
    # constant along the inner layer axis).  This single per-batch-tile copy is
    # amortized over all L layer steps (cheaper than re-loading x every layer).
    @pl.when(l == 0)
    def _():
        o_ref[...] = x_ref[...]

    x = o_ref[...].astype(jnp.float32)                       # (rows, D)
    xm = x.astype(mm_dtype)

    # ---- fused Q/K/V projection: one (rows, D) x (D, 3D) MXU matmul ----
    # (1/sqrt(D) softmax scale is pre-folded into wq / bq in the wrapper)
    qkv = jnp.dot(xm, wqkv_ref[...], preferred_element_type=jnp.float32) + bqkv_ref[...]
    q = qkv[:, :d_model].reshape(n_seq, seq_len, d_model)
    k = qkv[:, d_model:2 * d_model].reshape(n_seq, seq_len, d_model)
    v = qkv[:, 2 * d_model:].reshape(n_seq, seq_len, d_model)

    # ---- single-head self-attention over each sequence in the tile ----
    scores = jnp.einsum("bsd,btd->bst", q.astype(mm_dtype), k.astype(mm_dtype),
                        preferred_element_type=jnp.float32)
    m = jnp.max(scores, axis=-1, keepdims=True)
    e = jnp.exp(scores - m)
    denom = jnp.sum(e, axis=-1, keepdims=True)
    if approx_softmax:
        p = e * pl.reciprocal(denom, approx=True)            # EUP slot, VALU-free
    else:
        p = e / denom
    attn = jnp.einsum("bst,btd->bsd", p.astype(mm_dtype), v.astype(mm_dtype),
                      preferred_element_type=jnp.float32).reshape(rows, d_model)

    # unpack small packed per-layer params (static slices of the (6, D) slab)
    bo = pvec_ref[0:1, :]
    b2 = pvec_ref[1:2, :]
    g1 = pvec_ref[2:3, :]
    be1 = pvec_ref[3:4, :]
    g2 = pvec_ref[4:5, :]
    be2 = pvec_ref[5:6, :]

    attn = jnp.dot(attn.astype(mm_dtype), wo_ref[...],
                   preferred_element_type=jnp.float32) + bo

    # ---- add & LayerNorm 1 (f32 VPU math) ----
    h = _ln_f32(x + attn, g1, be1, eps)

    # ---- feed-forward (ReLU) ----
    f = jnp.dot(h.astype(mm_dtype), w1_ref[...], preferred_element_type=jnp.float32) + b1_ref[...]
    f = jnp.maximum(f, 0.0)
    f = jnp.dot(f.astype(mm_dtype), w2_ref[...], preferred_element_type=jnp.float32) + b2

    # ---- add & LayerNorm 2 ----
    out = _ln_f32(h + f, g2, be2, eps)

    # Single store per step; final LayerNorm applied to the in-register value
    # on the last layer (no store -> reload -> store round trip).
    if apply_final_norm:
        @pl.when(l == last)
        def _():
            gf = fnorm_ref[0:1, :]
            bf = fnorm_ref[1:2, :]
            o_ref[...] = _ln_f32(out, gf, bf, eps).astype(o_ref.dtype)

        @pl.when(l != last)
        def _():
            o_ref[...] = out.astype(o_ref.dtype)
    else:
        o_ref[...] = out.astype(o_ref.dtype)


# ----------------------------- wrapper --------------------------------------


def encoder_forward_pallas(x, layer_params_list, norm_params=None, *,
                           eps=1e-5, mm_dtype=jnp.bfloat16, batch_block=None,
                           approx_softmax=True, vmem_limit_bytes=None):
    """Encoder.forward: sequentially apply encode_layers, then optional norm.

    Entire stack runs in a single pallas_call; activations stay in VMEM across
    layers; per-layer weights are streamed in along the layer grid axis.

    Note: the inter-layer residual stream is kept at x.dtype; pass f32 inputs
    for an f32 residual stream (only the matmuls run in `mm_dtype`).
    For best layout, D should be a multiple of 128 and S a multiple of 8
    (the small demo shapes below violate this; they're correctness-sized).
    """
    B, S, D = x.shape
    L = len(layer_params_list)
    d_ff = layer_params_list[0]["w1"].shape[1]

    if batch_block is None:
        batch_block = _pick_batch_block(B, S)
    assert B % batch_block == 0
    nb = B // batch_block
    rows_blk = batch_block * S

    if vmem_limit_bytes is None:
        vmem_limit_bytes = _default_vmem_limit_bytes()

    def stack(name):
        return jnp.stack([p[name] for p in layer_params_list], axis=0)

    scale = 1.0 / math.sqrt(D)

    # Fuse Q/K/V along the output dim, fold the softmax scale into wq/bq, and
    # pre-cast matmul weights to the MXU dtype (halves weight DMA bytes).
    # Biases / LN params stay f32.
    wqkv = jnp.concatenate(
        [stack("wq") * scale, stack("wk"), stack("wv")], axis=-1).astype(mm_dtype)
    bqkv = jnp.concatenate(
        [stack("bq") * scale, stack("bk"), stack("bv")], axis=-1)
    wo = stack("wo").astype(mm_dtype)
    w1 = stack("w1").astype(mm_dtype)
    b1 = stack("b1")
    w2 = stack("w2").astype(mm_dtype)

    # Pack the (1, D)-wide per-layer params into one (L, 6, D) slab:
    #   rows = [bo, b2, g1, be1, g2, be2]   -> 1 DMA instead of 6 per layer step
    pvec = jnp.stack([
        jnp.concatenate(
            [p["bo"], p["b2"], p["g1"], p["be1"], p["g2"], p["be2"]], axis=0)
        for p in layer_params_list], axis=0)                 # (L, 6, D)

    if norm_params is not None:
        fnorm = jnp.concatenate([norm_params["gamma"], norm_params["beta"]], axis=0)  # (2, D)
        apply_final_norm = True
    else:
        fnorm = jnp.concatenate(
            [jnp.ones((1, D), jnp.float32), jnp.zeros((1, D), jnp.float32)], axis=0)
        apply_final_norm = False

    x2 = x.reshape(B * S, D)

    def layer_spec(*dims):
        # leading layer dim squeezed; block index follows the layer grid axis
        return pl.BlockSpec((None,) + dims, lambda b, l: (l,) + (0,) * len(dims))

    def const_spec(*dims):
        return pl.BlockSpec(dims, lambda b, l: (0,) * len(dims))

    x_spec = pl.BlockSpec((rows_blk, D), lambda b, l: (b, 0))

    kernel = functools.partial(
        _fused_encoder_kernel,
        n_seq=batch_block, seq_len=S, d_model=D, eps=eps,
        mm_dtype=mm_dtype, apply_final_norm=apply_final_norm,
        approx_softmax=approx_softmax)

    out2 = pl.pallas_call(
        kernel,
        out_shape=jax.ShapeDtypeStruct((B * S, D), x.dtype),
        grid_spec=pltpu.PrefetchScalarGridSpec(
            num_scalar_prefetch=0,
            grid=(nb, L),                       # layer axis innermost -> sequential per tile
            in_specs=[
                x_spec,
                layer_spec(D, 3 * D), layer_spec(1, 3 * D),   # wqkv, bqkv
                layer_spec(D, D),                             # wo
                layer_spec(D, d_ff), layer_spec(1, d_ff),     # w1, b1
                layer_spec(d_ff, D),                          # w2
                layer_spec(6, D),                             # packed small params
                const_spec(2, D),                             # final LN params
            ],
            out_specs=x_spec,
        ),
        compiler_params=pltpu.CompilerParams(
            dimension_semantics=("parallel", "arbitrary"),
            vmem_limit_bytes=vmem_limit_bytes),
    )(x2, wqkv, bqkv, wo, w1, b1, w2, pvec, fnorm)

    return out2.reshape(B, S, D)


# ----------------------------- parameter init ------------------------------


def init_layer_params(key, d_model, d_ff):
    ks = jax.random.split(key, 6)
    s = 1.0 / math.sqrt(d_model)
    sf = 1.0 / math.sqrt(d_ff)
    return {
        "wq": jax.random.uniform(ks[0], (d_model, d_model), jnp.float32, -s, s),
        "bq": jnp.zeros((1, d_model), jnp.float32),
        "wk": jax.random.uniform(ks[1], (d_model, d_model), jnp.float32, -s, s),
        "bk": jnp.zeros((1, d_model), jnp.float32),
        "wv": jax.random.uniform(ks[2], (d_model, d_model), jnp.float32, -s, s),
        "bv": jnp.zeros((1, d_model), jnp.float32),
        "wo": jax.random.uniform(ks[3], (d_model, d_model), jnp.float32, -s, s),
        "bo": jnp.zeros((1, d_model), jnp.float32),
        "w1": jax.random.uniform(ks[4], (d_model, d_ff), jnp.float32, -s, s),
        "b1": jnp.zeros((1, d_ff), jnp.float32),
        "w2": jax.random.uniform(ks[5], (d_ff, d_model), jnp.float32, -sf, sf),
        "b2": jnp.zeros((1, d_model), jnp.float32),
        "g1": jnp.ones((1, d_model), jnp.float32),
        "be1": jnp.zeros((1, d_model), jnp.float32),
        "g2": jnp.ones((1, d_model), jnp.float32),
        "be2": jnp.zeros((1, d_model), jnp.float32),
    }


# ----------------------------- reference (pure JAX, mirrors bf16 matmuls) ----


def _ref_mm(a, w, dt):
    return jnp.dot(a.astype(dt), w.astype(dt), preferred_element_type=jnp.float32)


def _ref_ln(x, g, b, eps=1e-5):
    mu = jnp.mean(x, axis=-1, keepdims=True)
    var = jnp.mean((x - mu) ** 2, axis=-1, keepdims=True)
    return (x - mu) * jax.lax.rsqrt(var + eps) * g + b


def _ref_layer(x, p, eps, dt):
    B, S, D = x.shape
    xr = x.reshape(B * S, D)
    q = (_ref_mm(xr, p["wq"], dt) + p["bq"]).reshape(B, S, D)
    k = (_ref_mm(xr, p["wk"], dt) + p["bk"]).reshape(B, S, D)
    v = (_ref_mm(xr, p["wv"], dt) + p["bv"]).reshape(B, S, D)
    scores = jnp.einsum("bsd,btd->bst", q.astype(dt), k.astype(dt),
                        preferred_element_type=jnp.float32) / math.sqrt(D)
    pr = jax.nn.softmax(scores, axis=-1)
    attn = jnp.einsum("bst,btd->bsd", pr.astype(dt), v.astype(dt),
                      preferred_element_type=jnp.float32).reshape(B * S, D)
    attn = _ref_mm(attn, p["wo"], dt) + p["bo"]
    h = _ref_ln(xr + attn, p["g1"], p["be1"], eps)
    f = jnp.maximum(_ref_mm(h, p["w1"], dt) + p["b1"], 0.0)
    f = _ref_mm(f, p["w2"], dt) + p["b2"]
    return _ref_ln(h + f, p["g2"], p["be2"], eps).reshape(B, S, D)


def _ref_encoder(x, layers, norm, dt=jnp.bfloat16, eps=1e-5):
    for p in layers:
        x = _ref_layer(x, p, eps, dt)
    if norm is not None:
        x = _ref_ln(x, norm["gamma"][0], norm["beta"][0], eps)
    return x


# ----------------------------- main ----------------------------------------


if __name__ == "__main__":
    B, S, D, D_FF, N_LAYERS = 2, 8, 32, 64, 2

    key = jax.random.PRNGKey(0)
    kx, *klayers = jax.random.split(key, 1 + N_LAYERS)

    x = jax.random.normal(kx, (B, S, D), jnp.float32)
    layer_params = [init_layer_params(k, D, D_FF) for k in klayers]
    norm_params = {
        "gamma": jnp.ones((1, D), jnp.float32),
        "beta": jnp.zeros((1, D), jnp.float32),
    }

    fwd = jax.jit(encoder_forward_pallas)
    out = fwd(x, layer_params, norm_params)
    out = jax.block_until_ready(out)

    ref = _ref_encoder(x, layer_params, norm_params)
    assert out.shape == (B, S, D)
    assert jnp.allclose(out, ref, atol=1e-2, rtol=1e-2), "mismatch vs pure-JAX reference"

    print("KERNEL_OK")
</pallas_src>

<mosaic_0001>
module attributes {stable_mosaic.version = 11 : i64} {
  func.func @_fused_encoder_kernel(%arg0: i32, %arg1: i32, %arg2: memref<16x32xf32, #tpu.memory_space<vmem>>, %arg3: memref<1x32x96xbf16, #tpu.memory_space<vmem>>, %arg4: memref<1x1x96xf32, #tpu.memory_space<vmem>>, %arg5: memref<1x32x32xbf16, #tpu.memory_space<vmem>>, %arg6: memref<1x32x64xbf16, #tpu.memory_space<vmem>>, %arg7: memref<1x1x64xf32, #tpu.memory_space<vmem>>, %arg8: memref<1x64x32xbf16, #tpu.memory_space<vmem>>, %arg9: memref<1x6x32xf32, #tpu.memory_space<vmem>>, %arg10: memref<2x32xf32, #tpu.memory_space<vmem>>, %arg11: memref<16x32xf32, #tpu.memory_space<vmem>>) attributes {dimension_semantics = [#tpu.dimension_semantics<parallel>, #tpu.dimension_semantics<arbitrary>], iteration_bounds = array<i64: 1, 2>, scalar_prefetch = 0 : i64, scratch_operands = 0 : i64, tpu.core_type = #tpu.core_type<tc>, window_params = [{transform_indices = @transform_0, window_bounds = array<i64: 16, 32>}, {transform_indices = @transform_1, window_bounds = array<i64: 1, 32, 96>}, {transform_indices = @transform_2, window_bounds = array<i64: 1, 1, 96>}, {transform_indices = @transform_3, window_bounds = array<i64: 1, 32, 32>}, {transform_indices = @transform_4, window_bounds = array<i64: 1, 32, 64>}, {transform_indices = @transform_5, window_bounds = array<i64: 1, 1, 64>}, {transform_indices = @transform_6, window_bounds = array<i64: 1, 64, 32>}, {transform_indices = @transform_7, window_bounds = array<i64: 1, 6, 32>}, {pipeline_mode = #tpu.pipeline_mode<synchronous>, transform_indices = @transform_8, window_bounds = array<i64: 2, 32>}, {transform_indices = @transform_9, window_bounds = array<i64: 16, 32>}]} {
    %c0_i32 = arith.constant 0 : i32
    %0 = arith.cmpi eq, %arg1, %c0_i32 : i32
    %1 = arith.extui %0 : i1 to i32
    %c0_i32_0 = arith.constant 0 : i32
    %2 = arith.cmpi ne, %1, %c0_i32_0 : i32
    scf.if %2 {
      %c0_56 = arith.constant 0 : index
      %c0_57 = arith.constant 0 : index
      %125 = vector.load %arg2[%c0_56, %c0_57] : memref<16x32xf32, #tpu.memory_space<vmem>>, vector<16x32xf32>
      %c0_58 = arith.constant 0 : index
      %c0_59 = arith.constant 0 : index
      %126 = vector.load %arg11[%c0_58, %c0_59] : memref<16x32xf32, #tpu.memory_space<vmem>>, vector<16x32xf32>
      tpu.vector_store %arg11[%c0_58, %c0_59], %125 {strides = array<i32>} : memref<16x32xf32, #tpu.memory_space<vmem>>, vector<16x32xf32>,
    } else {
    }
    %c0 = arith.constant 0 : index
    %c0_1 = arith.constant 0 : index
    %3 = vector.load %arg11[%c0, %c0_1] : memref<16x32xf32, #tpu.memory_space<vmem>>, vector<16x32xf32>
    %4 = arith.truncf %3 : vector<16x32xf32> to vector<16x32xbf16>
    %c0_2 = arith.constant 0 : index
    %c0_3 = arith.constant 0 : index
    %c0_4 = arith.constant 0 : index
    %5 = vector.load %arg3[%c0_2, %c0_3, %c0_4] : memref<1x32x96xbf16, #tpu.memory_space<vmem>>, vector<1x32x96xbf16>
    %6 = vector.shape_cast %5 : vector<1x32x96xbf16> to vector<32x96xbf16>
    %cst = arith.constant dense<0.000000e+00> : vector<16x96xf32>
    %7 = tpu.matmul %4, %6, %cst {dimension_numbers = #tpu.dot_dimension_numbers<[1], [0], [0], [1], [0, 0, 1, 1], [], []>} : vector<16x32xbf16>, vector<32x96xbf16>, vector<16x96xf32> -> vector<16x96xf32>
    %c0_5 = arith.constant 0 : index
    %c0_6 = arith.constant 0 : index
    %c0_7 = arith.constant 0 : index
    %8 = vector.load %arg4[%c0_5, %c0_6, %c0_7] : memref<1x1x96xf32, #tpu.memory_space<vmem>>, vector<1x1x96xf32>
    %9 = vector.shape_cast %8 : vector<1x1x96xf32> to vector<1x96xf32>
    %10 = vector.broadcast %9 : vector<1x96xf32> to vector<16x96xf32>
    %11 = arith.addf %7, %10 : vector<16x96xf32>
    %12 = vector.extract_strided_slice %11 {offsets = [0, 0], sizes = [16, 32], strides = [1, 1]} : vector<16x96xf32> to vector<16x32xf32>
    %13 = vector.shape_cast %12 : vector<16x32xf32> to vector<2x8x32xf32>
    %14 = vector.extract_strided_slice %11 {offsets = [0, 32], sizes = [16, 32], strides = [1, 1]} : vector<16x96xf32> to vector<16x32xf32>
    %15 = vector.shape_cast %14 : vector<16x32xf32> to vector<2x8x32xf32>
    %16 = vector.extract_strided_slice %11 {offsets = [0, 64], sizes = [16, 32], strides = [1, 1]} : vector<16x96xf32> to vector<16x32xf32>
    %17 = vector.shape_cast %16 : vector<16x32xf32> to vector<2x8x32xf32>
    %18 = arith.truncf %13 : vector<2x8x32xf32> to vector<2x8x32xbf16>
    %19 = arith.truncf %15 : vector<2x8x32xf32> to vector<2x8x32xbf16>
    "tpu.trace_start"() <{level = 10 : i32, message = "bsd,btd->bst"}> : () -> ()
    %cst_8 = arith.constant dense<0.000000e+00> : vector<2x8x8xf32>
    %20 = tpu.matmul %18, %19, %cst_8 {dimension_numbers = #tpu.dot_dimension_numbers<[2], [2], [1], [1], [0, 0, 0, 1, 1, 1], [0], [0]>} : vector<2x8x32xbf16>, vector<2x8x32xbf16>, vector<2x8x8xf32> -> vector<2x8x8xf32>
    "tpu.trace_stop"() : () -> ()
    %cst_9 = arith.constant dense<0xFF800000> : vector<2x8xf32>
    %21 = vector.multi_reduction <maximumf>, %20, %cst_9 [2] : vector<2x8x8xf32> to vector<2x8xf32>
    %22 = vector.shape_cast %21 : vector<2x8xf32> to vector<2x8x1xf32>
    %23 = vector.broadcast %22 : vector<2x8x1xf32> to vector<2x8x8xf32>
    %24 = arith.subf %20, %23 : vector<2x8x8xf32>
    %25 = math.exp %24 : vector<2x8x8xf32>
    %cst_10 = arith.constant dense<0.000000e+00> : vector<2x8xf32>
    %26 = vector.multi_reduction <add>, %25, %cst_10 [2] : vector<2x8x8xf32> to vector<2x8xf32>
    %27 = vector.shape_cast %26 : vector<2x8xf32> to vector<2x8x1xf32>
    %28 = tpu.reciprocal %27 {approx = true} : vector<2x8x1xf32> -> vector<2x8x1xf32>
    %29 = vector.broadcast %28 : vector<2x8x1xf32> to vector<2x8x8xf32>
    %30 = arith.mulf %25, %29 : vector<2x8x8xf32>
    %31 = arith.truncf %30 : vector<2x8x8xf32> to vector<2x8x8xbf16>
    %32 = arith.truncf %17 : vector<2x8x32xf32> to vector<2x8x32xbf16>
    "tpu.trace_start"() <{level = 10 : i32, message = "bst,btd->bsd"}> : () -> ()
    %cst_11 = arith.constant dense<0.000000e+00> : vector<2x8x32xf32>
    %33 = tpu.matmul %31, %32, %cst_11 {dimension_numbers = #tpu.dot_dimension_numbers<[2], [1], [1], [2], [0, 0, 0, 1, 1, 2], [0], [0]>} : vector<2x8x8xbf16>, vector<2x8x32xbf16>, vector<2x8x32xf32> -> vector<2x8x32xf32>
    "tpu.trace_stop"() : () -> ()
    %34 = vector.shape_cast %33 : vector<2x8x32xf32> to vector<16x32xf32>
    %c0_12 = arith.constant 0 : index
    %c0_13 = arith.constant 0 : index
    %c0_14 = arith.constant 0 : index
    %35 = vector.load %arg9[%c0_12, %c0_13, %c0_14] : memref<1x6x32xf32, #tpu.memory_space<vmem>>, vector<1x1x32xf32>
    %36 = vector.shape_cast %35 : vector<1x1x32xf32> to vector<1x32xf32>
    %c0_15 = arith.constant 0 : index
    %c1 = arith.constant 1 : index
    %c0_16 = arith.constant 0 : index
    %37 = vector.load %arg9[%c0_15, %c1, %c0_16] : memref<1x6x32xf32, #tpu.memory_space<vmem>>, vector<1x1x32xf32>
    %38 = vector.shape_cast %37 : vector<1x1x32xf32> to vector<1x32xf32>
    %c0_17 = arith.constant 0 : index
    %c2 = arith.constant 2 : index
    %c0_18 = arith.constant 0 : index
    %39 = vector.load %arg9[%c0_17, %c2, %c0_18] : memref<1x6x32xf32, #tpu.memory_space<vmem>>, vector<1x1x32xf32>
    %40 = vector.shape_cast %39 : vector<1x1x32xf32> to vector<1x32xf32>
    %c0_19 = arith.constant 0 : index
    %c3 = arith.constant 3 : index
    %c0_20 = arith.constant 0 : index
    %41 = vector.load %arg9[%c0_19, %c3, %c0_20] : memref<1x6x32xf32, #tpu.memory_space<vmem>>, vector<1x1x32xf32>
    %42 = vector.shape_cast %41 : vector<1x1x32xf32> to vector<1x32xf32>
    %c0_21 = arith.constant 0 : index
    %c4 = arith.constant 4 : index
    %c0_22 = arith.constant 0 : index
    %43 = vector.load %arg9[%c0_21, %c4, %c0_22] : memref<1x6x32xf32, #tpu.memory_space<vmem>>, vector<1x1x32xf32>
    %44 = vector.shape_cast %43 : vector<1x1x32xf32> to vector<1x32xf32>
    %c0_23 = arith.constant 0 : index
    %c5 = arith.constant 5 : index
    %c0_24 = arith.constant 0 : index
    %45 = vector.load %arg9[%c0_23, %c5, %c0_24] : memref<1x6x32xf32, #tpu.memory_space<vmem>>, vector<1x1x32xf32>
    %46 = vector.shape_cast %45 : vector<1x1x32xf32> to vector<1x32xf32>
    %47 = arith.truncf %34 : vector<16x32xf32> to vector<16x32xbf16>
    %c0_25 = arith.constant 0 : index
    %c0_26 = arith.constant 0 : index
    %c0_27 = arith.constant 0 : index
    %48 = vector.load %arg5[%c0_25, %c0_26, %c0_27] : memref<1x32x32xbf16, #tpu.memory_space<vmem>>, vector<1x32x32xbf16>
    %49 = vector.shape_cast %48 : vector<1x32x32xbf16> to vector<32x32xbf16>
    %cst_28 = arith.constant dense<0.000000e+00> : vector<16x32xf32>
    %50 = tpu.matmul %47, %49, %cst_28 {dimension_numbers = #tpu.dot_dimension_numbers<[1], [0], [0], [1], [0, 0, 1, 1], [], []>} : vector<16x32xbf16>, vector<32x32xbf16>, vector<16x32xf32> -> vector<16x32xf32>
    %51 = vector.broadcast %36 : vector<1x32xf32> to vector<16x32xf32>
    %52 = arith.addf %50, %51 : vector<16x32xf32>
    %53 = arith.addf %3, %52 : vector<16x32xf32>
    %cst_29 = arith.constant dense<0.000000e+00> : vector<16xf32>
    %54 = vector.multi_reduction <add>, %53, %cst_29 [1] : vector<16x32xf32> to vector<16xf32>
    %55 = vector.shape_cast %54 : vector<16xf32> to vector<16x1xf32>
    %cst_30 = arith.constant 3.200000e+01 : f32
    %56 = vector.broadcast %cst_30 : f32 to vector<16x1xf32>
    %57 = arith.divf %55, %56 : vector<16x1xf32>
    %58 = arith.mulf %53, %53 : vector<16x32xf32>
    %cst_31 = arith.constant dense<0.000000e+00> : vector<16xf32>
    %59 = vector.multi_reduction <add>, %58, %cst_31 [1] : vector<16x32xf32> to vector<16xf32>
    %60 = vector.shape_cast %59 : vector<16xf32> to vector<16x1xf32>
    %cst_32 = arith.constant 3.200000e+01 : f32
    %61 = vector.broadcast %cst_32 : f32 to vector<16x1xf32>
    %62 = arith.divf %60, %61 : vector<16x1xf32>
    %63 = arith.mulf %57, %57 : vector<16x1xf32>
    %64 = arith.subf %62, %63 : vector<16x1xf32>
    %cst_33 = arith.constant 0.000000e+00 : f32
    %65 = vector.broadcast %cst_33 : f32 to vector<16x1xf32>
    %66 = arith.maximumf %64, %65 : vector<16x1xf32>
    %67 = vector.broadcast %57 : vector<16x1xf32> to vector<16x32xf32>
    %68 = arith.subf %53, %67 : vector<16x32xf32>
    %cst_34 = arith.constant 9.99999974E-6 : f32
    %69 = vector.broadcast %cst_34 : f32 to vector<16x1xf32>
    %70 = arith.addf %66, %69 : vector<16x1xf32>
    %71 = math.rsqrt %70 : vector<16x1xf32>
    %72 = vector.broadcast %71 : vector<16x1xf32> to vector<16x32xf32>
    %73 = arith.mulf %68, %72 : vector<16x32xf32>
    %74 = vector.broadcast %40 : vector<1x32xf32> to vector<16x32xf32>
    %75 = arith.mulf %73, %74 : vector<16x32xf32>
    %76 = vector.broadcast %42 : vector<1x32xf32> to vector<16x32xf32>
    %77 = arith.addf %75, %76 : vector<16x32xf32>
    %78 = arith.truncf %77 : vector<16x32xf32> to vector<16x32xbf16>
    %c0_35 = arith.constant 0 : index
    %c0_36 = arith.constant 0 : index
    %c0_37 = arith.constant 0 : index
    %79 = vector.load %arg6[%c0_35, %c0_36, %c0_37] : memref<1x32x64xbf16, #tpu.memory_space<vmem>>, vector<1x32x64xbf16>
    %80 = vector.shape_cast %79 : vector<1x32x64xbf16> to vector<32x64xbf16>
    %cst_38 = arith.constant dense<0.000000e+00> : vector<16x64xf32>
    %81 = tpu.matmul %78, %80, %cst_38 {dimension_numbers = #tpu.dot_dimension_numbers<[1], [0], [0], [1], [0, 0, 1, 1], [], []>} : vector<16x32xbf16>, vector<32x64xbf16>, vector<16x64xf32> -> vector<16x64xf32>
    %c0_39 = arith.constant 0 : index
    %c0_40 = arith.constant 0 : index
    %c0_41 = arith.constant 0 : index
    %82 = vector.load %arg7[%c0_39, %c0_40, %c0_41] : memref<1x1x64xf32, #tpu.memory_space<vmem>>, vector<1x1x64xf32>
    %83 = vector.shape_cast %82 : vector<1x1x64xf32> to vector<1x64xf32>
    %84 = vector.broadcast %83 : vector<1x64xf32> to vector<16x64xf32>
    %85 = arith.addf %81, %84 : vector<16x64xf32>
    %cst_42 = arith.constant 0.000000e+00 : f32
    %86 = vector.broadcast %cst_42 : f32 to vector<16x64xf32>
    %87 = arith.maximumf %85, %86 : vector<16x64xf32>
    %88 = arith.truncf %87 : vector<16x64xf32> to vector<16x64xbf16>
    %c0_43 = arith.constant 0 : index
    %c0_44 = arith.constant 0 : index
    %c0_45 = arith.constant 0 : index
    %89 = vector.load %arg8[%c0_43, %c0_44, %c0_45] : memref<1x64x32xbf16, #tpu.memory_space<vmem>>, vector<1x64x32xbf16>
    %90 = vector.shape_cast %89 : vector<1x64x32xbf16> to vector<64x32xbf16>
    %cst_46 = arith.constant dense<0.000000e+00> : vector<16x32xf32>
    %91 = tpu.matmul %88, %90, %cst_46 {dimension_numbers = #tpu.dot_dimension_numbers<[1], [0], [0], [1], [0, 0, 1, 1], [], []>} : vector<16x64xbf16>, vector<64x32xbf16>, vector<16x32xf32> -> vector<16x32xf32>
    %92 = vector.broadcast %38 : vector<1x32xf32> to vector<16x32xf32>
    %93 = arith.addf %91, %92 : vector<16x32xf32>
    %94 = arith.addf %77, %93 : vector<16x32xf32>
    %cst_47 = arith.constant dense<0.000000e+00> : vector<16xf32>
    %95 = vector.multi_reduction <add>, %94, %cst_47 [1] : vector<16x32xf32> to vector<16xf32>
    %96 = vector.shape_cast %95 : vector<16xf32> to vector<16x1xf32>
    %cst_48 = arith.constant 3.200000e+01 : f32
    %97 = vector.broadcast %cst_48 : f32 to vector<16x1xf32>
    %98 = arith.divf %96, %97 : vector<16x1xf32>
    %99 = arith.mulf %94, %94 : vector<16x32xf32>
    %cst_49 = arith.constant dense<0.000000e+00> : vector<16xf32>
    %100 = vector.multi_reduction <add>, %99, %cst_49 [1] : vector<16x32xf32> to vector<16xf32>
    %101 = vector.shape_cast %100 : vector<16xf32> to vector<16x1xf32>
    %cst_50 = arith.constant 3.200000e+01 : f32
    %102 = vector.broadcast %cst_50 : f32 to vector<16x1xf32>
    %103 = arith.divf %101, %102 : vector<16x1xf32>
    %104 = arith.mulf %98, %98 : vector<16x1xf32>
    %105 = arith.subf %103, %104 : vector<16x1xf32>
    %cst_51 = arith.constant 0.000000e+00 : f32
    %106 = vector.broadcast %cst_51 : f32 to vector<16x1xf32>
    %107 = arith.maximumf %105, %106 : vector<16x1xf32>
    %108 = vector.broadcast %98 : vector<16x1xf32> to vector<16x32xf32>
    %109 = arith.subf %94, %108 : vector<16x32xf32>
    %cst_52 = arith.constant 9.99999974E-6 : f32
    %110 = vector.broadcast %cst_52 : f32 to vector<16x1xf32>
    %111 = arith.addf %107, %110 : vector<16x1xf32>
    %112 = math.rsqrt %111 : vector<16x1xf32>
    %113 = vector.broadcast %112 : vector<16x1xf32> to vector<16x32xf32>
    %114 = arith.mulf %109, %113 : vector<16x32xf32>
    %115 = vector.broadcast %44 : vector<1x32xf32> to vector<16x32xf32>
    %116 = arith.mulf %114, %115 : vector<16x32xf32>
    %117 = vector.broadcast %46 : vector<1x32xf32> to vector<16x32xf32>
    %118 = arith.addf %116, %117 : vector<16x32xf32>
    %c1_i32 = arith.constant 1 : i32
    %119 = arith.cmpi eq, %arg1, %c1_i32 : i32
    %120 = arith.extui %119 : i1 to i32
    %c0_i32_53 = arith.constant 0 : i32
    %121 = arith.cmpi ne, %120, %c0_i32_53 : i32
    scf.if %121 {
      %c0_56 = arith.constant 0 : index
      %c0_57 = arith.constant 0 : index
      %125 = vector.load %arg10[%c0_56, %c0_57] : memref<2x32xf32, #tpu.memory_space<vmem>>, vector<1x32xf32>
      %c1_58 = arith.constant 1 : index
      %c0_59 = arith.constant 0 : index
      %126 = vector.load %arg10[%c1_58, %c0_59] : memref<2x32xf32, #tpu.memory_space<vmem>>, vector<1x32xf32>
      %cst_60 = arith.constant dense<0.000000e+00> : vector<16xf32>
      %127 = vector.multi_reduction <add>, %118, %cst_60 [1] : vector<16x32xf32> to vector<16xf32>
      %128 = vector.shape_cast %127 : vector<16xf32> to vector<16x1xf32>
      %cst_61 = arith.constant 3.200000e+01 : f32
      %129 = vector.broadcast %cst_61 : f32 to vector<16x1xf32>
      %130 = arith.divf %128, %129 : vector<16x1xf32>
      %131 = arith.mulf %118, %118 : vector<16x32xf32>
      %cst_62 = arith.constant dense<0.000000e+00> : vector<16xf32>
      %132 = vector.multi_reduction <add>, %131, %cst_62 [1] : vector<16x32xf32> to vector<16xf32>
      %133 = vector.shape_cast %132 : vector<16xf32> to vector<16x1xf32>
      %cst_63 = arith.constant 3.200000e+01 : f32
      %134 = vector.broadcast %cst_63 : f32 to vector<16x1xf32>
      %135 = arith.divf %133, %134 : vector<16x1xf32>
      %136 = arith.mulf %130, %130 : vector<16x1xf32>
      %137 = arith.subf %135, %136 : vector<16x1xf32>
      %cst_64 = arith.constant 0.000000e+00 : f32
      %138 = vector.broadcast %cst_64 : f32 to vector<16x1xf32>
      %139 = arith.maximumf %137, %138 : vector<16x1xf32>
      %140 = vector.broadcast %130 : vector<16x1xf32> to vector<16x32xf32>
      %141 = arith.subf %118, %140 : vector<16x32xf32>
      %cst_65 = arith.constant 9.99999974E-6 : f32
      %142 = vector.broadcast %cst_65 : f32 to vector<16x1xf32>
      %143 = arith.addf %139, %142 : vector<16x1xf32>
      %144 = math.rsqrt %143 : vector<16x1xf32>
      %145 = vector.broadcast %144 : vector<16x1xf32> to vector<16x32xf32>
      %146 = arith.mulf %141, %145 : vector<16x32xf32>
      %147 = vector.broadcast %125 : vector<1x32xf32> to vector<16x32xf32>
      %148 = arith.mulf %146, %147 : vector<16x32xf32>
      %149 = vector.broadcast %126 : vector<1x32xf32> to vector<16x32xf32>
      %150 = arith.addf %148, %149 : vector<16x32xf32>
      %c0_66 = arith.constant 0 : index
      %c0_67 = arith.constant 0 : index
      %151 = vector.load %arg11[%c0_66, %c0_67] : memref<16x32xf32, #tpu.memory_space<vmem>>, vector<16x32xf32>
      tpu.vector_store %arg11[%c0_66, %c0_67], %150 {strides = array<i32>} : memref<16x32xf32, #tpu.memory_space<vmem>>, vector<16x32xf32>,
    } else {
    }
    %c1_i32_54 = arith.constant 1 : i32
    %122 = arith.cmpi ne, %arg1, %c1_i32_54 : i32
    %123 = arith.extui %122 : i1 to i32
    %c0_i32_55 = arith.constant 0 : i32
    %124 = arith.cmpi ne, %123, %c0_i32_55 : i32
    scf.if %124 {
      %c0_56 = arith.constant 0 : index
      %c0_57 = arith.constant 0 : index
      %125 = vector.load %arg11[%c0_56, %c0_57] : memref<16x32xf32, #tpu.memory_space<vmem>>, vector<16x32xf32>
      tpu.vector_store %arg11[%c0_56, %c0_57], %118 {strides = array<i32>} : memref<16x32xf32, #tpu.memory_space<vmem>>, vector<16x32xf32>,
    } else {
    }
    return
  }
  func.func @transform_0(%arg0: i32, %arg1: i32) -> (i32, i32) {
    %c0_i32 = arith.constant 0 : i32
    %c0_i32_0 = arith.constant 0 : i32
    return %arg0, %c0_i32 : i32, i32
  }
  func.func @transform_1(%arg0: i32, %arg1: i32) -> (i32, i32, i32) {
    %c0_i32 = arith.constant 0 : i32
    %c0_i32_0 = arith.constant 0 : i32
    %c0_i32_1 = arith.constant 0 : i32
    return %arg1, %c0_i32, %c0_i32_0 : i32, i32, i32
  }
  func.func @transform_2(%arg0: i32, %arg1: i32) -> (i32, i32, i32) {
    %c0_i32 = arith.constant 0 : i32
    %c0_i32_0 = arith.constant 0 : i32
    %c0_i32_1 = arith.constant 0 : i32
    return %arg1, %c0_i32, %c0_i32_0 : i32, i32, i32
  }
  func.func @transform_3(%arg0: i32, %arg1: i32) -> (i32, i32, i32) {
    %c0_i32 = arith.constant 0 : i32
    %c0_i32_0 = arith.constant 0 : i32
    %c0_i32_1 = arith.constant 0 : i32
    return %arg1, %c0_i32, %c0_i32_0 : i32, i32, i32
  }
  func.func @transform_4(%arg0: i32, %arg1: i32) -> (i32, i32, i32) {
    %c0_i32 = arith.constant 0 : i32
    %c0_i32_0 = arith.constant 0 : i32
    %c0_i32_1 = arith.constant 0 : i32
    return %arg1, %c0_i32, %c0_i32_0 : i32, i32, i32
  }
  func.func @transform_5(%arg0: i32, %arg1: i32) -> (i32, i32, i32) {
    %c0_i32 = arith.constant 0 : i32
    %c0_i32_0 = arith.constant 0 : i32
    %c0_i32_1 = arith.constant 0 : i32
    return %arg1, %c0_i32, %c0_i32_0 : i32, i32, i32
  }
  func.func @transform_6(%arg0: i32, %arg1: i32) -> (i32, i32, i32) {
    %c0_i32 = arith.constant 0 : i32
    %c0_i32_0 = arith.constant 0 : i32
    %c0_i32_1 = arith.constant 0 : i32
    return %arg1, %c0_i32, %c0_i32_0 : i32, i32, i32
  }
  func.func @transform_7(%arg0: i32, %arg1: i32) -> (i32, i32, i32) {
    %c0_i32 = arith.constant 0 : i32
    %c0_i32_0 = arith.constant 0 : i32
    %c0_i32_1 = arith.constant 0 : i32
    return %arg1, %c0_i32, %c0_i32_0 : i32, i32, i32
  }
  func.func @transform_8(%arg0: i32, %arg1: i32) -> (i32, i32) {
    %c0_i32 = arith.constant 0 : i32
    %c0_i32_0 = arith.constant 0 : i32
    %c0_i32_1 = arith.constant 0 : i32
    return %c0_i32, %c0_i32_0 : i32, i32
  }
  func.func @transform_9(%arg0: i32, %arg1: i32) -> (i32, i32) {
    %c0_i32 = arith.constant 0 : i32
    %c0_i32_0 = arith.constant 0 : i32
    return %arg0, %c0_i32 : i32, i32
  }
}

</mosaic_0001>

<bundles_post_ra>
// kernel: encoder_forward_pallas.1
= control target key start
LH: loop header
LB: loop body
LE: loop exit
PB: predicated region body
PF: predicated region fallthrough
CT: control target
= control target key end

     0   :  { %s1551_s0 = inlined_call_operand.vmem [shape: f32[16,32], index: 0, kind: input, shape index: {}]   ;;  %s1552_s1 = inlined_call_operand.vmem [shape: bf16[2,32,96], index: 1, kind: input, shape index: {}]   ;;  %s1553_s2 = inlined_call_operand.vmem [shape: f32[2,1,96], index: 2, kind: input, shape index: {}]   ;;  %s1554_s3 = inlined_call_operand.vmem [shape: bf16[2,32,32], index: 3, kind: input, shape index: {}]   ;;  %s1555_s4 = inlined_call_operand.vmem [shape: bf16[2,32,64], index: 4, kind: input, shape index: {}]   ;;  %s1556_s5 = inlined_call_operand.vmem [shape: f32[2,1,64], index: 5, kind: input, shape index: {}]   ;;  %s1557_s6 = inlined_call_operand.vmem [shape: bf16[2,64,32], index: 6, kind: input, shape index: {}]   ;;  %s1558_s7 = inlined_call_operand.vmem [shape: f32[2,6,32], index: 7, kind: input, shape index: {}]   ;;  %s1559_s8 = inlined_call_operand.vmem [shape: f32[2,32], index: 8, kind: input, shape index: {}]   ;;  %s1560_s9 = inlined_call_operand.hbm [shape: f32[16,32], index: 9, kind: output, shape index: {}]  }
   0x1   :  { %1561 = sst [smem:[#allocation6_spill]] %s1553_s2 }
   0x2   :  { %14 = vsyncpa [#allocation3], 0  ;;  %s1367_s30 = smov 0   ;;  %s1369_s10 = smov 0  }
   0x3   :  { %s1371_s11 = smov 0  }
   0x4 LB: > { %s29_s13 = sadd.s32 1, %s1305_s10  ;;  %p1108_p1 = scmp.ge.s32.totalorder %s1309_s11, 1  ;;  %s1309_s11 = sphi %s1371_s11, %s20_s11   ;;  %s1305_s10 = sphi %s1369_s10, %s1567_s10   ;;  %s1301_s30 = sphi %s1367_s30, %s1566_s30  }
   0x5   : > { %p30_p0 = scmp.ge.s32.totalorder %s29_s13, 2  ;;  %p366_p2 = scmp.lt.s32.totalorder %s1309_s11, 3 }
   0x7   : > { %s1569_s13 = smov (%p30_p0, %s29_s13), 0  ;;  %p367_p3 = pnand %p1108_p1, %p366_p2 }
   0x8   : > { %1562 = sst [smem:[#allocation5_spill]] %s1569_s13  ;;  %p433_p4 = scmp.lt.s32.totalorder (!%p367_p3), %s1301_s30, 1 }
   0x9   : > { %370 = sbr.rel (%p367_p3) target bundleno = 1735 (0x6c7), region = 56  ;;  %s1563_s2 = sld [smem:[#allocation6_spill]] (!%p367_p3) }
   0xa   : > { %p1118_p5 = scmp.ne.s32.totalorder (!%p367_p3), %s1301_s30, 0 }
   0xe   : > { %s1390_s14 = scalar_select %p433_p4, %s1301_s30, 1 }
  0x10   : > { %s1173_s15 = sshll.u32 %s1390_s14, 4  ;;  %s440_s18 = scalar_lea.vmem %s1563_s2, %s1390_s14 }
  0x11   : > { %s437_s21 = scalar_lea.vmem %s1552_s1, %s1173_s15  ;;  %s1403_s24 = scalar_lea.vmem %s1554_s3, %s1173_s15 }
  0x12   : > { %s1408_s27 = scalar_lea.vmem %s1555_s4, %s1173_s15  ;;  %s453_s12 = scalar_lea.vmem %s1556_s5, %s1390_s14 }
  0x13   : > { %s1176_s16 = sshll.u32 %s1390_s14, 5  ;;  %s1117_s17 = sshll.u32 %s1390_s14, 3 }
  0x14   : > { %s1419_s19 = scalar_lea.vmem %s1557_s6, %s1176_s16  ;;  %s1424_s23 = scalar_lea.vmem %s1558_s7, %s1117_s17 }
  0x15   : > { %468 = sbr.rel (%p1118_p5) target bundleno = 29 (0x1d), region = 60 }
  0x1a   : > { %v469_v0 = vld [vmem:[%s1551_s0] sm:$0xff]  ;;  %vm471_vm0 = vcmask 261120   ;;  %v470_v1 = vld [vmem:[%s1551_s0 + $0x8] sm:$0xff] }
  0x1b   : > { %472 = vst.msk [vmem:[#allocation2] sm:$0xff] %vm471_vm0, %v469_v0 }
  0x1c   : > { %473 = vst.msk [vmem:[#allocation2 + $0x8] sm:$0xff] %vm471_vm0, %v470_v1 }
  0x1d PF: > { %v1178_v2 = vld [vmem:[%s437_s21 + $0x8] sm:$0xff]  ;;  %v1177_v3 = vld [vmem:[%s437_s21] sm:$0xff]  ;;  %vm497_vm1 = vcmask 261120   ;;  %s1311_s2 = smov 96   ;;  %vm565_vm2 = vcmask 64512   ;;  %s1312_s13 = smov 64  }
  0x1e   : > { %507 = vmatpush.bf16.msra.mxu0 %v1178_v2  ;;  %v1223_v7 = vld [vmem:[%s440_s18] ss:$0 sm:$0xff]  ;;  %vm595_vm3 = vcmask 1043456   ;;  %v1180_v50 = vld [vmem:[%s1403_s24 + $0x8] sm:$0xff]  ;;  %vm813_vm11 = vcmask 523264   ;;  %p1167_p6 = scmp.ne.s32.totalorder %s1301_s30, 1 }
  0x1f   : > { %v1179_v51 = vld [vmem:[%s1403_s24] sm:$0xff] }
  0x20   : > { %v1224_v57 = vld [vmem:[%s1424_s23] ss:$0 sm:$0xff] }
  0x22   : > { %v1433_v4 = vld [vmem:[#allocation2] sm:$0xff]  ;;  %508 = vmatpush.bf16.msra.mxu0 %v1177_v3 }
  0x23   : > { %v1435_v5 = vld [vmem:[#allocation2 + $0x8] sm:$0xff] }
  0x24   : > { %v476_v6 = vpack.c.bf16 %v1435_v5, %v1433_v4 }
  0x26   : > { %1127 = vmatmul.msk.bf16.vlgmr.msra.gmra.mxu0 %vm497_vm1, %v476_v6 }
  0x27   : > { %666 = vmatpush.bf16.msrb.mxu0 %v1180_v50 }
  0x2b   : > { %667 = vmatpush.bf16.msrb.mxu0 %v1179_v51 }
  0xa3   : > { %v510_v8 = vpop.f32.mrf.mxu0 }
  0xa4   : > { %v511_v9 = vadd.f32 %v1223_v7, %v510_v8 }
  0xa6   : > { %v515_v10 = vpack.c.bf16 %v511_v9, %v511_v9 }
  0xa8   : > { %v518_v11 = vunpack.c.l.b16 %v515_v10 }
  0xaa   : > { %v519_v12 = vpack.c.b16 %v518_v11, %v518_v11 }
  0xab   : > { %v512_v13 = vpop.f32.mrf.mxu0 }
  0xac   : > { %v513_v14 = vadd.f32 %v1223_v7, %v512_v13  ;;  %520 = vrot.lane.b32.xlu0 %v519_v12, %s1311_s2  ;;  %v1313_v7 = vmov 32.0  }
  0xae   : > { %v516_v15 = vpack.c.bf16 %v513_v14, %v513_v14 }
  0xb0   : > { %v542_v16 = vunpack.c.l.b16 %v516_v15 }
  0xb2   : > { %v543_v17 = vpack.c.b16 %v542_v16, %v542_v16 }
  0xb4   : > { %544 = vrot.lane.b32.xlu0 %v543_v17, %s1311_s2 }
 0x11e   : > { %v521_v18 = vpop.permute.xlu0 %520 }
 0x11f   : > { %v526_v19 = vsel %vm497_vm1, %v521_v18, 0 }
 0x120   : > { %535 = vmatpush.bf16.xpose.msra.mxu1 %v526_v19  ;;  %v1182_v19 = vld [vmem:[%s1408_s27 + $0x8] sm:$0xff] }
 0x126   : > { %v545_v20 = vpop.permute.xlu0 %544 }
 0x127   : > { %1128 = vmatmul.msk.bf16.vlgmr.msra.gmra.mxu1 %vm497_vm1, %v515_v10  ;;  %v550_v21 = vsel %vm497_vm1, %v545_v20, 0 }
 0x128   : > { %559 = vmatpush.bf16.xpose.msra.mxu2 %v550_v21  ;;  %769 = vmatpush.bf16.msrb.mxu1 %v1182_v19  ;;  %v1181_v21 = vld [vmem:[%s1408_s27] sm:$0xff] }
 0x12c   : > { %770 = vmatpush.bf16.msrb.mxu1 %v1181_v21 }
 0x12f   : > { %1129 = vmatmul.msk.bf16.vlgmr.msra.gmra.mxu2 %vm497_vm1, %v516_v15 }
 0x1a4   : > { %v537_v22 = vpop.f32.mrf.mxu1 }
 0x1a5   : > { %v566_v23 = vsel %vm565_vm2, %v537_v22, -inf }
 0x1a6   : > { %567 = vmax.xlane.f32.xlu1 %v566_v23 }
 0x1ac   : > { %v539_v24 = vpop.f32.mrf.mxu1 }
 0x1b2   : > { %v561_v25 = vpop.f32.mrf.mxu2 }
 0x1b3   : > { %v569_v26 = vsel %vm565_vm2, %v561_v25, -inf }
 0x1b4   : > { %570 = vmax.xlane.f32.xlu1 %v569_v26 }
 0x1ba   : > { %v563_v27 = vpop.f32.mrf.mxu2 }
 0x1cd   : > { %612 = vrot.lane.b32.xlu1 %v543_v17, %s1312_s13 }
 0x219   : > { %v568_v28 = vpop.xlane.xlu1 %567 }
 0x21a   : > { %v572_v29 = vsub.f32 %v537_v22, %v568_v28 }
 0x21c   : > { %v574_v30 = vmul.f32 1.442695, %v572_v29  ;;  %v1186_v29 = vld [vmem:[%s1419_s19 + $0x18] sm:$0xff] }
 0x21d   : > { %821 = vmatpush.bf16.msrb.mxu2 %v1186_v29 }
 0x21e   : > { %1231 = vpow2.f32 %v574_v30 }
 0x224   : > { %v1232_v31 = vpop.eup %1231 }
 0x225   : > { %v578_v32 = vsel %vm565_vm2, %v1232_v31, 0.0 }
 0x226   : > { %579 = vadd.xlane.f32.xlu2 %v578_v32 }
 0x227   : > { %v571_v33 = vpop.xlane.xlu1 %570 }
 0x228   : > { %v573_v34 = vsub.f32 %v561_v25, %v571_v33 }
 0x22a   : > { %v576_v35 = vmul.f32 1.442695, %v573_v34 }
 0x22c   : > { %1233 = vpow2.f32 %v576_v35 }
 0x232   : > { %v1234_v36 = vpop.eup %1233 }
 0x233   : > { %v581_v37 = vsel %vm565_vm2, %v1234_v36, 0.0 }
 0x234   : > { %582 = vadd.xlane.f32.xlu0 %v581_v37 }
 0x23e   : > { %590 = vrot.lane.b32.xlu2 %v519_v12, %s1312_s13 }
 0x23f   : > { %v613_v40 = vpop.permute.xlu1 %612 }
 0x240   : > { %v618_v44 = vsel %vm595_vm3, %v613_v40, 0 }
 0x299   : > { %v580_v38 = vpop.xlane.xlu2 %579 }
 0x29a   : > { %1235 = vrcp.f32 %v580_v38 }
 0x2a0   : > { %v1236_v39 = vpop.eup %1235 }
 0x2a1   : > { %v591_v41 = vpop.permute.xlu2 %590  ;;  %v586_v42 = vmul.f32 %v1236_v39, %v1232_v31 }
 0x2a2   : > { %v597_v43 = vsel %vm595_vm3, %v591_v41, 0 }
 0x2a3   : > { %606 = vmatpush.bf16.msra.mxu3 %v597_v43  ;;  %v588_v45 = vpack.c.bf16 %v586_v42, %v586_v42 }
 0x2a6   : > { %1130 = vmatmul.msk.bf16.vlgmr.msra.gmra.mxu3 %vm565_vm2, %v588_v45 }
 0x2a7   : > { %627 = vmatpush.bf16.msrb.mxu3 %v618_v44  ;;  %v583_v46 = vpop.xlane.xlu0 %582 }
 0x2a8   : > { %1237 = vrcp.f32 %v583_v46  ;;  %v1225_v46 = vld [vmem:[%s1424_s23 + $0x2] ss:$0 sm:$0xff] }
 0x2a9   : > { %1239 = vrcp.f32 %v1313_v7 }
 0x2ae   : > { %v1238_v47 = vpop.eup %1237 }
 0x2af   : > { %v587_v48 = vmul.f32 %v1238_v47, %v1234_v36  ;;  %v1240_v8 = vpop.eup %1239 }
 0x2b0   : > { %v683_v9 = vmul.f32 32.0, %v1240_v8  ;;  %vm687_vm4 = vweird.f32 %v1240_v8 }
 0x2b1   : > { %v589_v49 = vpack.c.bf16 %v587_v48, %v587_v48 }
 0x2b2   : > { %v684_v10 = vsub.f32 1.0, %v683_v9 }
 0x2b4   : > { %v685_v11 = vmul.f32 %v1240_v8, %v684_v10 }
 0x2b6   : > { %1131 = vmatmul.msk.bf16.vlgmr.msrb.gmra.mxu3 %vm565_vm2, %v589_v49 }
 0x329   : > { %v608_v52 = vpop.f32.mrf.mxu3 }
 0x331   : > { %v610_v53 = vpop.f32.mrf.mxu3 }
 0x339   : > { %v629_v54 = vpop.f32.mrf.mxu3 }
 0x33a   : > { %v639_v55 = vpack.c.bf16 %v629_v54, %v608_v52  ;;  %v1226_v52 = vld [vmem:[%s1424_s23 + $0x3] ss:$0 sm:$0xff] }
 0x33c   : > { %1140 = vmatmul.msk.bf16.vlgmr.msrb.gmra.mxu0 %vm497_vm1, %v639_v55 }
 0x341   : > { %v631_v56 = vpop.f32.mrf.mxu3 }
 0x3b9   : > { %v669_v58 = vpop.f32.mrf.mxu0 }
 0x3ba   : > { %v670_v59 = vadd.f32 %v1224_v57, %v669_v58  ;;  %v1184_v58 = vld [vmem:[%s1419_s19 + $0x8] sm:$0xff] }
 0x3bc   : > { %v1455_v60 = vadd.f32 %v670_v59, %v1433_v4  ;;  %v1183_v59 = vld [vmem:[%s1419_s19] sm:$0xff] }
 0x3be   : > { %v676_v61 = vsel %vm497_vm1, %v1455_v60, 0.0  ;;  %v691_v62 = vmul.f32 %v1455_v60, %v1455_v60 }
 0x3bf   : > { %677 = vadd.xlane.f32.xlu2 %v676_v61  ;;  %v1227_v61 = vld [vmem:[%s453_s12] ss:$0 sm:$0xff] }
 0x3c0   : > { %v693_v63 = vsel %vm497_vm1, %v691_v62, 0.0 }
 0x3c1   : > { %v671_v0 = vpop.f32.mrf.mxu0  ;;  %694 = vadd.xlane.f32.xlu0 %v693_v63 }
 0x3c2   : > { %v672_v1 = vadd.f32 %v1224_v57, %v671_v0  ;;  %v1185_v57 = vld [vmem:[%s1419_s19 + $0x10] sm:$0xff] }
 0x3c3   : > { %822 = vmatpush.bf16.msrb.mxu2 %v1185_v57 }
 0x3c4   : > { %v1463_v2 = vadd.f32 %v672_v1, %v1435_v5  ;;  %v686_v5 = vadd.f32 %v1240_v8, %v685_v11 }
 0x3c6   : > { %v679_v3 = vsel %vm497_vm1, %v1463_v2, 0.0  ;;  %v692_v4 = vmul.f32 %v1463_v2, %v1463_v2  ;;  %v1470_v12 = vsel %vm687_vm4, %v1240_v8, %v686_v5 }
 0x3c7   : > { %680 = vadd.xlane.f32.xlu1 %v679_v3  ;;  %823 = vmatpush.bf16.msrb.mxu2 %v1184_v58 }
 0x3c8   : > { %v696_v6 = vsel %vm497_vm1, %v692_v4, 0.0  ;;  %v1228_v4 = vld [vmem:[%s1424_s23 + $0x1] ss:$0 sm:$0xff] }
 0x3c9   : > { %697 = vadd.xlane.f32.xlu0 %v696_v6 }
 0x3cb   : > { %824 = vmatpush.bf16.msrb.mxu2 %v1183_v59 }
 0x432   : > { %v678_v13 = vpop.xlane.xlu2 %677 }
 0x433   : > { %v689_v14 = vmul.f32 %v1470_v12, %v678_v13 }
 0x434   : > { %v695_v15 = vpop.xlane.xlu0 %694 }
 0x435   : > { %v701_v16 = vmul.f32 %v689_v14, %v689_v14  ;;  %v699_v17 = vmul.f32 %v695_v15, %v1470_v12  ;;  %v707_v43 = vsub.f32 %v1455_v60, %v689_v14 }
 0x437   : > { %v703_v18 = vsub.f32 %v699_v17, %v701_v16 }
 0x439   : > { %v705_v20 = vmax.f32 %v703_v18, 0.0 }
 0x43a   : > { %v681_v22 = vpop.xlane.xlu1 %680 }
 0x43b   : > { %v709_v23 = vadd.f32 1e-05, %v705_v20  ;;  %v690_v24 = vmul.f32 %v1470_v12, %v681_v22 }
 0x43c   : > { %v698_v25 = vpop.xlane.xlu0 %697 }
 0x43d   : > { %1241 = vrsqrt.f32 %v709_v23  ;;  %v702_v26 = vmul.f32 %v690_v24, %v690_v24  ;;  %v700_v27 = vmul.f32 %v698_v25, %v1470_v12  ;;  %vm717_vm6 = vweird.f32 %v709_v23 }
 0x43e   : > { %v708_v48 = vsub.f32 %v1463_v2, %v690_v24 }
 0x43f   : > { %v704_v28 = vsub.f32 %v700_v27, %v702_v26 }
 0x441   : > { %v706_v30 = vmax.f32 %v704_v28, 0.0 }
 0x443   : > { %v1242_v31 = vpop.eup %1241  ;;  %v710_v33 = vadd.f32 1e-05, %v706_v30 }
 0x444   : > { %v712_v32 = vmul.f32 %v1242_v31, %v709_v23  ;;  %vm718_vm5 = vweird.f32 %v1242_v31 }
 0x445   : > { %1243 = vrsqrt.f32 %v710_v33  ;;  %vm719_vm7 = vmor %vm717_vm6, %vm718_vm5  ;;  %vm727_vm9 = vweird.f32 %v710_v33 }
 0x446   : > { %v713_v34 = vmul.f32 %v1242_v31, %v712_v32 }
 0x448   : > { %v714_v35 = vmul.f32 0.5, %v713_v34 }
 0x44a   : > { %v715_v36 = vsub.f32 1.5, %v714_v35 }
 0x44b   : > { %v1244_v37 = vpop.eup %1243 }
 0x44c   : > { %v716_v38 = vmul.f32 %v1242_v31, %v715_v36  ;;  %v722_v39 = vmul.f32 %v1244_v37, %v710_v33  ;;  %vm728_vm8 = vweird.f32 %v1244_v37 }
 0x44d   : > { %vm729_vm10 = vmor %vm727_vm9, %vm728_vm8 }
 0x44e   : > { %v723_v40 = vmul.f32 %v1244_v37, %v722_v39  ;;  %v720_v41 = vsel %vm719_vm7, %v1242_v31, %v716_v38 }
 0x44f   : > { %v731_v45 = vmul.f32 %v720_v41, %v707_v43  ;;  %v1229_v43 = vld [vmem:[%s1424_s23 + $0x4] ss:$0 sm:$0xff] }
 0x450   : > { %v724_v42 = vmul.f32 0.5, %v723_v40 }
 0x451   : > { %v734_v51 = vmul.f32 %v1225_v46, %v731_v45 }
 0x452   : > { %v725_v44 = vsub.f32 1.5, %v724_v42 }
 0x453   : > { %v737_v54 = vadd.f32 %v1226_v52, %v734_v51 }
 0x454   : > { %v726_v47 = vmul.f32 %v1244_v37, %v725_v44 }
 0x456   : > { %v730_v49 = vsel %vm729_vm10, %v1244_v37, %v726_v47 }
 0x457   : > { %v732_v50 = vmul.f32 %v730_v49, %v708_v48 }
 0x459   : > { %v735_v53 = vmul.f32 %v1225_v46, %v732_v50  ;;  %v1230_v46 = vld [vmem:[%s1424_s23 + $0x5] ss:$0 sm:$0xff] }
 0x45b   : > { %v738_v55 = vadd.f32 %v1226_v52, %v735_v53 }
 0x45d   : > { %v739_v56 = vpack.c.bf16 %v738_v55, %v737_v54 }
 0x45f   : > { %1149 = vmatmul.msk.bf16.vlgmr.msrb.gmra.mxu1 %vm497_vm1, %v739_v56 }
 0x4dc   : > { %v772_v60 = vpop.f32.mrf.mxu1 }
 0x4dd   : > { %v773_v62 = vadd.f32 %v1227_v61, %v772_v60 }
 0x4df   : > { %v777_v1 = vmax.f32 %v773_v62, 0.0 }
 0x4e4   : > { %v774_v63 = vpop.f32.mrf.mxu1 }
 0x4e5   : > { %v775_v0 = vadd.f32 %v1227_v61, %v774_v63 }
 0x4e7   : > { %v778_v2 = vmax.f32 %v775_v0, 0.0 }
 0x4e9   : > { %v779_v3 = vpack.c.bf16 %v778_v2, %v777_v1 }
 0x4eb   : > { %1166 = vmatmul.msk.bf16.vlgmr.msrb.gmra.mxu2 %vm813_vm11, %v779_v3 }
 0x56e   : > { %v826_v6 = vpop.f32.mrf.mxu2 }
 0x56f   : > { %v827_v7 = vadd.f32 %v1228_v4, %v826_v6 }
 0x571   : > { %v831_v8 = vadd.f32 %v827_v7, %v737_v54 }
 0x573   : > { %v833_v9 = vsel %vm497_vm1, %v831_v8, 0.0  ;;  %v841_v5 = vmul.f32 %v831_v8, %v831_v8 }
 0x574   : > { %834 = vadd.xlane.f32.xlu2 %v833_v9 }
 0x575   : > { %v843_v15 = vsel %vm497_vm1, %v841_v5, 0.0 }
 0x576   : > { %v828_v10 = vpop.f32.mrf.mxu2 }
 0x577   : > { %v829_v11 = vadd.f32 %v1228_v4, %v828_v10 }
 0x579   : > { %v832_v13 = vadd.f32 %v829_v11, %v738_v55 }
 0x57b   : > { %v836_v14 = vsel %vm497_vm1, %v832_v13, 0.0  ;;  %v842_v16 = vmul.f32 %v832_v13, %v832_v13 }
 0x57c   : > { %837 = vadd.xlane.f32.xlu0 %v836_v14  ;;  %844 = vadd.xlane.f32.xlu2 %v843_v15 }
 0x57d   : > { %v846_v17 = vsel %vm497_vm1, %v842_v16, 0.0 }
 0x584   : > { %847 = vadd.xlane.f32.xlu0 %v846_v17 }
 0x5e7   : > { %v835_v18 = vpop.xlane.xlu2 %834 }
 0x5e8   : > { %v839_v19 = vmul.f32 %v835_v18, %v1470_v12 }
 0x5ea   : > { %v851_v22 = vmul.f32 %v839_v19, %v839_v19  ;;  %v857_v42 = vsub.f32 %v831_v8, %v839_v19 }
 0x5ef   : > { %v838_v20 = vpop.xlane.xlu0 %837  ;;  %v845_v21 = vpop.xlane.xlu2 %844 }
 0x5f0   : > { %v849_v23 = vmul.f32 %v845_v21, %v1470_v12  ;;  %v840_v25 = vmul.f32 %v838_v20, %v1470_v12 }
 0x5f2   : > { %v853_v24 = vsub.f32 %v849_v23, %v851_v22  ;;  %v852_v29 = vmul.f32 %v840_v25, %v840_v25  ;;  %v858_v53 = vsub.f32 %v832_v13, %v840_v25 }
 0x5f4   : > { %v855_v26 = vmax.f32 %v853_v24, 0.0 }
 0x5f6   : > { %v859_v27 = vadd.f32 1e-05, %v855_v26 }
 0x5f7   : > { %v848_v28 = vpop.xlane.xlu0 %847 }
 0x5f8   : > { %1245 = vrsqrt.f32 %v859_v27  ;;  %v850_v30 = vmul.f32 %v848_v28, %v1470_v12  ;;  %vm867_vm13 = vweird.f32 %v859_v27 }
 0x5fa   : > { %v854_v31 = vsub.f32 %v850_v30, %v852_v29 }
 0x5fc   : > { %v856_v32 = vmax.f32 %v854_v31, 0.0 }
 0x5fe   : > { %v1246_v33 = vpop.eup %1245  ;;  %v860_v34 = vadd.f32 1e-05, %v856_v32 }
 0x5ff   : > { %v862_v35 = vmul.f32 %v1246_v33, %v859_v27  ;;  %vm868_vm12 = vweird.f32 %v1246_v33 }
 0x600   : > { %1247 = vrsqrt.f32 %v860_v34  ;;  %vm869_vm14 = vmor %vm867_vm13, %vm868_vm12  ;;  %vm877_vm0 = vweird.f32 %v860_v34 }
 0x601   : > { %v863_v36 = vmul.f32 %v1246_v33, %v862_v35 }
 0x603   : > { %v864_v37 = vmul.f32 0.5, %v863_v36 }
 0x605   : > { %v865_v38 = vsub.f32 1.5, %v864_v37 }
 0x606   : > { %v1248_v39 = vpop.eup %1247 }
 0x607   : > { %v866_v40 = vmul.f32 %v1246_v33, %v865_v38  ;;  %v872_v41 = vmul.f32 %v1248_v39, %v860_v34  ;;  %vm878_vm15 = vweird.f32 %v1248_v39 }
 0x608   : > { %vm879_vm2 = vmor %vm877_vm0, %vm878_vm15 }
 0x609   : > { %v870_v44 = vsel %vm869_vm14, %v1246_v33, %v866_v40  ;;  %v873_v45 = vmul.f32 %v1248_v39, %v872_v41 }
 0x60a   : > { %v881_v47 = vmul.f32 %v870_v44, %v857_v42 }
 0x60b   : > { %v874_v48 = vmul.f32 0.5, %v873_v45 }
 0x60c   : > { %v884_v49 = vmul.f32 %v1229_v43, %v881_v47 }
 0x60d   : > { %v875_v50 = vsub.f32 1.5, %v874_v48 }
 0x60e   : > { %v1503_v51 = vadd.f32 %v1230_v46, %v884_v49 }
 0x60f   : > { %v876_v52 = vmul.f32 %v1248_v39, %v875_v50 }
 0x611   : > { %v880_v54 = vsel %vm879_vm2, %v1248_v39, %v876_v52 }
 0x612   : > { %v882_v55 = vmul.f32 %v880_v54, %v858_v53  ;;  %892 = sbr.rel (%p1167_p6) target bundleno = 1719 (0x6b7), region = 64 }
 0x614   : > { %v885_v56 = vmul.f32 %v1229_v43, %v882_v55 }
 0x616   : > { %v1505_v57 = vadd.f32 %v1230_v46, %v885_v56 }
 0x617   : > { %v895_v58 = vsel %vm497_vm1, %v1503_v51, 0.0  ;;  %v903_v59 = vmul.f32 %v1503_v51, %v1503_v51  ;;  %v1250_v28 = vld [vmem:[%s1559_s8 + $0x1] ss:$0 sm:$0xff] }
 0x618   : > { %896 = vadd.xlane.f32.xlu0 %v895_v58  ;;  %v904_v61 = vmul.f32 %v1505_v57, %v1505_v57  ;;  %v898_v62 = vsel %vm497_vm1, %v1505_v57, 0.0 }
 0x619   : > { %v905_v60 = vsel %vm497_vm1, %v903_v59, 0.0 }
 0x61a   : > { %906 = vadd.xlane.f32.xlu1 %v905_v60  ;;  %v908_v63 = vsel %vm497_vm1, %v904_v61, 0.0 }
 0x620   : > { %899 = vadd.xlane.f32.xlu0 %v898_v62 }
 0x622   : > { %909 = vadd.xlane.f32.xlu1 %v908_v63 }
 0x68b   : > { %v897_v0 = vpop.xlane.xlu0 %896 }
 0x68c   : > { %v901_v1 = vmul.f32 %v897_v0, %v1470_v12 }
 0x68d   : > { %v907_v2 = vpop.xlane.xlu1 %906 }
 0x68e   : > { %v913_v3 = vmul.f32 %v901_v1, %v901_v1  ;;  %v911_v4 = vmul.f32 %v907_v2, %v1470_v12  ;;  %v919_v24 = vsub.f32 %v1503_v51, %v901_v1 }
 0x690   : > { %v915_v6 = vsub.f32 %v911_v4, %v913_v3 }
 0x692   : > { %v917_v7 = vmax.f32 %v915_v6, 0.0 }
 0x693   : > { %v900_v8 = vpop.xlane.xlu0 %899 }
 0x694   : > { %v921_v9 = vadd.f32 1e-05, %v917_v7  ;;  %v902_v10 = vmul.f32 %v900_v8, %v1470_v12 }
 0x695   : > { %v910_v11 = vpop.xlane.xlu1 %909 }
 0x696   : > { %1251 = vrsqrt.f32 %v921_v9  ;;  %v914_v5 = vmul.f32 %v902_v10, %v902_v10  ;;  %v912_v13 = vmul.f32 %v910_v11, %v1470_v12  ;;  %vm929_vm4 = vweird.f32 %v921_v9  ;;  %v1249_v12 = vld [vmem:[%s1559_s8] ss:$0 sm:$0xff] }
 0x697   : > { %v920_v35 = vsub.f32 %v1505_v57, %v902_v10 }
 0x698   : > { %v916_v14 = vsub.f32 %v912_v13, %v914_v5 }
 0x69a   : > { %v918_v15 = vmax.f32 %v916_v14, 0.0 }
 0x69c   : > { %v1252_v16 = vpop.eup %1251  ;;  %v922_v18 = vadd.f32 1e-05, %v918_v15 }
 0x69d   : > { %v924_v17 = vmul.f32 %v1252_v16, %v921_v9  ;;  %vm930_vm3 = vweird.f32 %v1252_v16 }
 0x69e   : > { %1253 = vrsqrt.f32 %v922_v18  ;;  %vm931_vm5 = vmor %vm929_vm4, %vm930_vm3  ;;  %vm939_vm7 = vweird.f32 %v922_v18 }
 0x69f   : > { %v925_v19 = vmul.f32 %v1252_v16, %v924_v17 }
 0x6a1   : > { %v926_v20 = vmul.f32 0.5, %v925_v19 }
 0x6a3   : > { %v927_v21 = vsub.f32 1.5, %v926_v20 }
 0x6a4   : > { %v1254_v22 = vpop.eup %1253 }
 0x6a5   : > { %v928_v23 = vmul.f32 %v1252_v16, %v927_v21  ;;  %v934_v25 = vmul.f32 %v1254_v22, %v922_v18  ;;  %vm940_vm6 = vweird.f32 %v1254_v22 }
 0x6a6   : > { %vm941_vm8 = vmor %vm939_vm7, %vm940_vm6 }
 0x6a7   : > { %v932_v26 = vsel %vm931_vm5, %v1252_v16, %v928_v23  ;;  %v935_v29 = vmul.f32 %v1254_v22, %v934_v25 }
 0x6a8   : > { %v943_v27 = vmul.f32 %v932_v26, %v919_v24 }
 0x6a9   : > { %v936_v31 = vmul.f32 0.5, %v935_v29 }
 0x6aa   : > { %v946_v30 = vmul.f32 %v1249_v12, %v943_v27 }
 0x6ab   : > { %v937_v33 = vsub.f32 1.5, %v936_v31 }
 0x6ac   : > { %v949_v32 = vadd.f32 %v1250_v28, %v946_v30 }
 0x6ad   : > { %v938_v34 = vmul.f32 %v1254_v22, %v937_v33 }
 0x6ae   : > { %951 = vst.msk [vmem:[#allocation2] sm:$0xff] %vm497_vm1, %v949_v32 }
 0x6af   : > { %v942_v36 = vsel %vm941_vm8, %v1254_v22, %v938_v34 }
 0x6b0   : > { %v944_v37 = vmul.f32 %v942_v36, %v920_v35 }
 0x6b2   : > { %v947_v38 = vmul.f32 %v1249_v12, %v944_v37 }
 0x6b4   : > { %v950_v39 = vadd.f32 %v1250_v28, %v947_v38 }
 0x6b6   : > { %952 = vst.msk [vmem:[#allocation2 + $0x8] sm:$0xff] %vm497_vm1, %v950_v39 }
 0x6b7 PF: > { %p1168_p7 = scmp.eq.s32.totalorder %s1301_s30, 1 }
 0x6b9   : > { %956 = sbr.rel (%p1168_p7) target bundleno = 1728 (0x6c0), region = 68 }
 0x6be   : > { %957 = vst.msk [vmem:[#allocation2] sm:$0xff] %vm497_vm1, %v1503_v51 }
 0x6bf   : > { %958 = vst.msk [vmem:[#allocation2 + $0x8] sm:$0xff] %vm497_vm1, %v1505_v57 }
 0x6c0 PF: > { %s1564_s29 = sadd.s32 4294967295, %s1309_s11   ;;  %s969_s19 = sshll.u32 %s1560_s9, 4  ;;  %s970_s19 = int_to_ptr.hbm [resolvable:$true] %s969_s19 }
 0x6c1   : > { %p1191_p8 = scmp.eq.s32.totalorder %s1564_s29, 1  ;;  %s1314_s20 = smov [#allocation2]  }
 0x6c2   : > { %s967_s22 = sshll.u32 %s1314_s20, 4  ;;  %s1315_s30 = smov 128   ;;  %s968_s22 = int_to_ptr.vmem [resolvable:$true] %s967_s22 }
 0x6c3   : > { %s1316_s23 = smov 8  }
 0x6c4   : > { %1188 = dma.vmem_to_hbm [thread:$0]  (%p1191_p8), %s968_s22, 256, %s970_s19, [#allocation3], %s1315_s30, %s1315_s30, %s1316_s23  }
 0x6c5   : > { %1296 = dma.done.wait (%p1191_p8), [#allocation3], 256  }
 0x6c6   : > { %1298 = vsyncadd (%p1191_p8), [#allocation3], 4294967040 }
 0x6c7 PF: > { %s20_s11 = sadd.s32 1, %s1309_s11   ;;  %s1565_s15 = sld [smem:[#allocation5_spill]] }
 0x6c8   : > { %p17_p9 = scmp.ge.s32.totalorder %s20_s11, 4   ;;  %s1566_s30 = smov %s1305_s10 }
 0x6ca   :  { %19 = sbr.rel (!%p17_p9) target bundleno = 4 (0x4), region = 117 }
 0x6cd   : > { %s1567_s10 = smov %s1565_s15 }
 0x6cf   :  { %986 = vsyncpa [#allocation3], 1 }
 0x6d0   :  { %988 = vsyncpa [#allocation3 + $0x1], 1 }

</bundles_post_ra>
